<compile_context>
chip_gen: v7x
topology: tpu7x:2x2x1
jax: 0.10.0
libtpu: 0.0.40
codegen_flags: <defaults>
</compile_context>

<pallas_src>
import math

import jax
import jax.numpy as jnp
from jax.experimental import pallas as pl
from jax.experimental.pallas import tpu as pltpu

HIDDEN = 256
LANE = 128       # TPU lane width (last-dim vreg granularity)
SUBLANE = 8      # f32 sublane granularity for the batch (second-last) dim

VMEM_BUDGET_BYTES = 36 * 1024 * 1024   # footprint cap used to size the batch tile
VMEM_LIMIT_BYTES = 48 * 1024 * 1024    # scoped VMEM limit (fits v5e/v6e/v7x)


def _round_up(x, m):
    return ((x + m - 1) // m) * m


def _max_rows_for_vmem(in_size, out_size, budget_bytes=VMEM_BUDGET_BYTES):
    """Conservative per-row VMEM footprint -> max batch-tile rows."""
    lane_in = _round_up(in_size, LANE)
    lane_out = _round_up(out_size, LANE)
    per_row = (2 * lane_in * 4          # x tile (f32), double-buffered
               + 2 * lane_out * 4       # out tile (f32, lane-padded in VMEM), 2 bufs
               + HIDDEN * 4             # fc1 f32 activation
               + lane_in * 2 + HIDDEN * 2)   # bf16 casts feeding the MXU
    weights = 2 * (lane_in * HIDDEN * 2 + HIDDEN * 4
                   + HIDDEN * lane_out * 2 + lane_out * 4)
    avail = budget_bytes - weights
    return max(avail // per_row, SUBLANE)


def _batch_dim_semantics(num_steps):
    """Use CORE_PARALLEL only where it can help (v7x, even multi-step grid)."""
    try:
        kind = jax.devices()[0].device_kind.lower()
    except Exception:  # pragma: no cover - defensive
        kind = ""
    is_v7 = ("v7" in kind) or ("7x" in kind)
    if is_v7 and num_steps >= 2 and num_steps % 2 == 0:
        return (pltpu.CORE_PARALLEL,)
    return (pltpu.PARALLEL,)


def dqn_kernel(x_ref, w1_ref, b1_ref, w2_ref, b2_ref, o_ref):
    # Cast the f32 input stream to the (bf16) weight dtype on the VPU -- free under a
    # mem/overhead-bound regime, and avoids a separate wrapper-side XLA cast pass.
    x = x_ref[...].astype(w1_ref.dtype)
    # fc1: [TB, in] @ [in, H] on the MXU -> f32 accumulator.
    h = jnp.dot(x, w1_ref[...], preferred_element_type=jnp.float32)
    # Bias + ReLU in f32 on the VPU.
    h = jnp.maximum(h + b1_ref[...], 0.0)
    # fc2: bf16 MXU feed, f32 accumulation (intentional precision tradeoff vs f32).
    out = jnp.dot(h.astype(w2_ref.dtype), w2_ref[...],
                  preferred_element_type=jnp.float32)
    o_ref[...] = (out + b2_ref[...]).astype(o_ref.dtype)


def dqn_forward(x, w1, b1, w2, b2, *, block_b=4096):
    """Pallas forward pass of DQNAgent.

    x:  [B, input_size]            (any float dtype; cast to bf16 in-kernel)
    w1: [input_size, 256]  (bf16), b1: [1, 256]          (f32)
    w2: [256, output_size] (bf16), b2: [1, output_size]  (f32)
    returns: [B, output_size] float32
    """
    B, in_size = x.shape
    hidden = w1.shape[1]
    out_size = w2.shape[1]

    # --- batch tiling: biggest tile that fits the VMEM budget ---------------------
    tb_cap = min(block_b, _max_rows_for_vmem(in_size, out_size))
    if B <= tb_cap:
        # Single grid step; block dim == full array dim, so no divisibility / padding
        # requirements and no post-call slice.
        tb, b_pad = B, B
    else:
        tb = max((tb_cap // SUBLANE) * SUBLANE, SUBLANE)
        b_pad = _round_up(B, tb)
        if b_pad != B:
            x = jnp.pad(x, ((0, b_pad - B), (0, 0)))

    grid = (b_pad // tb,)

    out = pl.pallas_call(
        dqn_kernel,
        out_shape=jax.ShapeDtypeStruct((b_pad, out_size), jnp.float32),
        grid=grid,
        in_specs=[
            pl.BlockSpec((tb, in_size), lambda i: (i, 0)),       # x: streamed per tile
            pl.BlockSpec((in_size, hidden), lambda i: (0, 0)),   # w1: resident
            pl.BlockSpec((1, hidden), lambda i: (0, 0)),         # b1: resident
            pl.BlockSpec((hidden, out_size), lambda i: (0, 0)),  # w2: resident
            pl.BlockSpec((1, out_size), lambda i: (0, 0)),       # b2: resident
        ],
        # Unpadded output: block last dim equals the full array dim (legal); the
        # masked vst into VMEM is hidden, and HBM writeback is only the useful bytes.
        out_specs=pl.BlockSpec((tb, out_size), lambda i: (i, 0)),
        compiler_params=pltpu.CompilerParams(
            dimension_semantics=_batch_dim_semantics(grid[0]),
            vmem_limit_bytes=VMEM_LIMIT_BYTES,
        ),
    )(x, w1, b1, w2, b2)

    if b_pad != B:
        out = out[:B]
    return out


def init_dqn_params(key, input_size, output_size, hidden=HIDDEN,
                    weight_dtype=jnp.bfloat16):
    """PyTorch nn.Linear-style init (U[-1/sqrt(fan_in), 1/sqrt(fan_in)]).

    Weights are returned already transposed to [in, out] and cast to bf16 for the
    MXU; biases stay in f32 (added on the f32 accumulator)."""
    k1, k2, k3, k4 = jax.random.split(key, 4)
    bound1 = 1.0 / math.sqrt(input_size)
    bound2 = 1.0 / math.sqrt(hidden)
    w1 = jax.random.uniform(k1, (input_size, hidden), jnp.float32, -bound1, bound1)
    b1 = jax.random.uniform(k2, (1, hidden), jnp.float32, -bound1, bound1)
    w2 = jax.random.uniform(k3, (hidden, output_size), jnp.float32, -bound2, bound2)
    b2 = jax.random.uniform(k4, (1, output_size), jnp.float32, -bound2, bound2)
    return w1.astype(weight_dtype), b1, w2.astype(weight_dtype), b2


if __name__ == "__main__":
    key = jax.random.PRNGKey(0)
    kx, kp = jax.random.split(key)

    batch = 2
    input_size = 32
    output_size = 8

    x = jax.random.normal(kx, (batch, input_size), jnp.float32)
    w1, b1, w2, b2 = init_dqn_params(kp, input_size, output_size)

    out = dqn_forward(x, w1, b1, w2, b2)
    out = jax.block_until_ready(out)

    # Reference in plain JAX using the same bf16-feed / f32-accumulate path.
    xb = x.astype(w1.dtype)
    h_ref = jnp.maximum(
        jnp.dot(xb, w1, preferred_element_type=jnp.float32) + b1, 0.0)
    ref = jnp.dot(h_ref.astype(w2.dtype), w2,
                  preferred_element_type=jnp.float32) + b2

    assert out.shape == (batch, output_size)
    assert jnp.allclose(out, ref, atol=2e-2, rtol=2e-2), float(
        jnp.max(jnp.abs(out - ref)))

    print("KERNEL_OK")
</pallas_src>

<mosaic_0001>
module attributes {stable_mosaic.version = 11 : i64} {
  func.func @dqn_kernel(%arg0: i32, %arg1: memref<2x32xf32, #tpu.memory_space<vmem>>, %arg2: memref<32x256xbf16, #tpu.memory_space<vmem>>, %arg3: memref<1x256xf32, #tpu.memory_space<vmem>>, %arg4: memref<256x8xbf16, #tpu.memory_space<vmem>>, %arg5: memref<1x8xf32, #tpu.memory_space<vmem>>, %arg6: memref<2x8xf32, #tpu.memory_space<vmem>>) attributes {dimension_semantics = [#tpu.dimension_semantics<parallel>], iteration_bounds = array<i64: 1>, scalar_prefetch = 0 : i64, scratch_operands = 0 : i64, tpu.core_type = #tpu.core_type<tc>, window_params = [{transform_indices = @transform_0, window_bounds = array<i64: 2, 32>}, {pipeline_mode = #tpu.pipeline_mode<synchronous>, transform_indices = @transform_1, window_bounds = array<i64: 32, 256>}, {pipeline_mode = #tpu.pipeline_mode<synchronous>, transform_indices = @transform_2, window_bounds = array<i64: 1, 256>}, {pipeline_mode = #tpu.pipeline_mode<synchronous>, transform_indices = @transform_3, window_bounds = array<i64: 256, 8>}, {pipeline_mode = #tpu.pipeline_mode<synchronous>, transform_indices = @transform_4, window_bounds = array<i64: 1, 8>}, {transform_indices = @transform_5, window_bounds = array<i64: 2, 8>}]} {
    %c0 = arith.constant 0 : index
    %c0_0 = arith.constant 0 : index
    %0 = vector.load %arg1[%c0, %c0_0] : memref<2x32xf32, #tpu.memory_space<vmem>>, vector<2x32xf32>
    %1 = arith.truncf %0 : vector<2x32xf32> to vector<2x32xbf16>
    %c0_1 = arith.constant 0 : index
    %c0_2 = arith.constant 0 : index
    %2 = vector.load %arg2[%c0_1, %c0_2] : memref<32x256xbf16, #tpu.memory_space<vmem>>, vector<32x256xbf16>
    %cst = arith.constant dense<0.000000e+00> : vector<2x256xf32>
    %3 = tpu.matmul %1, %2, %cst {dimension_numbers = #tpu.dot_dimension_numbers<[1], [0], [0], [1], [0, 0, 1, 1], [], []>} : vector<2x32xbf16>, vector<32x256xbf16>, vector<2x256xf32> -> vector<2x256xf32>
    %c0_3 = arith.constant 0 : index
    %c0_4 = arith.constant 0 : index
    %4 = vector.load %arg3[%c0_3, %c0_4] : memref<1x256xf32, #tpu.memory_space<vmem>>, vector<1x256xf32>
    %5 = vector.broadcast %4 : vector<1x256xf32> to vector<2x256xf32>
    %6 = arith.addf %3, %5 : vector<2x256xf32>
    %cst_5 = arith.constant 0.000000e+00 : f32
    %7 = vector.broadcast %cst_5 : f32 to vector<2x256xf32>
    %8 = arith.maximumf %6, %7 : vector<2x256xf32>
    %9 = arith.truncf %8 : vector<2x256xf32> to vector<2x256xbf16>
    %c0_6 = arith.constant 0 : index
    %c0_7 = arith.constant 0 : index
    %10 = vector.load %arg4[%c0_6, %c0_7] : memref<256x8xbf16, #tpu.memory_space<vmem>>, vector<256x8xbf16>
    %cst_8 = arith.constant dense<0.000000e+00> : vector<2x8xf32>
    %11 = tpu.matmul %9, %10, %cst_8 {dimension_numbers = #tpu.dot_dimension_numbers<[1], [0], [0], [1], [0, 0, 1, 1], [], []>} : vector<2x256xbf16>, vector<256x8xbf16>, vector<2x8xf32> -> vector<2x8xf32>
    %c0_9 = arith.constant 0 : index
    %c0_10 = arith.constant 0 : index
    %12 = vector.load %arg5[%c0_9, %c0_10] : memref<1x8xf32, #tpu.memory_space<vmem>>, vector<1x8xf32>
    %13 = vector.broadcast %12 : vector<1x8xf32> to vector<2x8xf32>
    %14 = arith.addf %11, %13 : vector<2x8xf32>
    %c0_11 = arith.constant 0 : index
    %c0_12 = arith.constant 0 : index
    %15 = vector.load %arg6[%c0_11, %c0_12] : memref<2x8xf32, #tpu.memory_space<vmem>>, vector<2x8xf32>
    tpu.vector_store %arg6[%c0_11, %c0_12], %14 {strides = array<i32>} : memref<2x8xf32, #tpu.memory_space<vmem>>, vector<2x8xf32>,
    return
  }
  func.func @transform_0(%arg0: i32) -> (i32, i32) {
    %c0_i32 = arith.constant 0 : i32
    %c0_i32_0 = arith.constant 0 : i32
    return %arg0, %c0_i32 : i32, i32
  }
  func.func @transform_1(%arg0: i32) -> (i32, i32) {
    %c0_i32 = arith.constant 0 : i32
    %c0_i32_0 = arith.constant 0 : i32
    %c0_i32_1 = arith.constant 0 : i32
    return %c0_i32, %c0_i32_0 : i32, i32
  }
  func.func @transform_2(%arg0: i32) -> (i32, i32) {
    %c0_i32 = arith.constant 0 : i32
    %c0_i32_0 = arith.constant 0 : i32
    %c0_i32_1 = arith.constant 0 : i32
    return %c0_i32, %c0_i32_0 : i32, i32
  }
  func.func @transform_3(%arg0: i32) -> (i32, i32) {
    %c0_i32 = arith.constant 0 : i32
    %c0_i32_0 = arith.constant 0 : i32
    %c0_i32_1 = arith.constant 0 : i32
    return %c0_i32, %c0_i32_0 : i32, i32
  }
  func.func @transform_4(%arg0: i32) -> (i32, i32) {
    %c0_i32 = arith.constant 0 : i32
    %c0_i32_0 = arith.constant 0 : i32
    %c0_i32_1 = arith.constant 0 : i32
    return %c0_i32, %c0_i32_0 : i32, i32
  }
  func.func @transform_5(%arg0: i32) -> (i32, i32) {
    %c0_i32 = arith.constant 0 : i32
    %c0_i32_0 = arith.constant 0 : i32
    return %arg0, %c0_i32 : i32, i32
  }
}

</mosaic_0001>

<bundles_post_ra>
// kernel: tpu_custom_call.1
= control target key start
LH: loop header
LB: loop body
LE: loop exit
PB: predicated region body
PF: predicated region fallthrough
CT: control target
= control target key end

     0   :  { %v392_v2 = vmov 0   ;;  %vm60_vm0 = vcmask 261120   ;;  %s505_s0 = inlined_call_operand.vmem [shape: f32[2,32], index: 0, kind: input, shape index: {}]   ;;  %s506_s1 = inlined_call_operand.vmem [shape: bf16[32,256], index: 1, kind: input, shape index: {}]   ;;  %s507_s2 = inlined_call_operand.vmem [shape: f32[1,256], index: 2, kind: input, shape index: {}]   ;;  %s508_s3 = inlined_call_operand.vmem [shape: bf16[256,8], index: 3, kind: input, shape index: {}]   ;;  %s509_s4 = inlined_call_operand.vmem [shape: f32[1,8], index: 4, kind: input, shape index: {}]   ;;  %s510_s5 = inlined_call_operand.hbm [shape: f32[2,8], index: 5, kind: output, shape index: {}]  }
   0x1   :  { %v346_v0 = vld [vmem:[%s506_s1 + $0x4] ss:$8 sps:$4 sm:$0xff]   ;;  %v348_v1 = vld [vmem:[%s506_s1] ss:$8 sps:$4 sm:$0xff]   ;;  %96 = vmatprep.mubr.bf16.mxu0 %v392_v2  ;;  %v349_v3 = vld [vmem:[%s506_s1 + $0x14] ss:$8 sps:$4 sm:$0xff]  }
   0x2   :  { %64 = vmatprep.subr.bf16.mxu0 %v346_v0  ;;  %v351_v4 = vld [vmem:[%s506_s1 + $0x10] ss:$8 sps:$4 sm:$0xff]   ;;  %v22_v5 = vld [vmem:[%s505_s0] sm:$0x3]  ;;  %v354_v8 = vld [vmem:[%s508_s3 + $0x48] sm:$0xff]  }
   0x3   :  { %65 = vmatpush1.bf16.msra.mxu0 %v348_v1  ;;  %v352_v6 = vld [vmem:[%s508_s3 + $0x40] sm:$0xff]   ;;  %v23_v9 = vpack.c.bf16 %v22_v5, %v22_v5  ;;  %v355_v10 = vld [vmem:[%s508_s3 + $0x8] sm:$0xff]   ;;  %v356_v11 = vld [vmem:[%s508_s3 + $0x50] sm:$0xff]  }
   0x4   :  { %66 = vmatprep.subr.bf16.mxu0 %v349_v3  ;;  %v353_v7 = vld [vmem:[%s508_s3] sm:$0xff]   ;;  %322 = vmatprep.subr.bf16.mxu1 %v352_v6  ;;  %v357_v12 = vld [vmem:[%s508_s3 + $0x10] sm:$0xff]   ;;  %v358_v13 = vld [vmem:[%s508_s3 + $0x58] sm:$0xff]  }
   0x5   :  { %323 = vmatpush3.bf16.msra.mxu1 %v353_v7  ;;  %v359_v14 = vld [vmem:[%s508_s3 + $0x18] sm:$0xff]   ;;  %v360_v15 = vld [vmem:[%s508_s3 + $0x60] sm:$0xff]  }
   0x6   :  { %324 = vmatprep.subr.bf16.mxu1 %v354_v8  ;;  %v361_v16 = vld [vmem:[%s508_s3 + $0x20] sm:$0xff]  }
   0x7   :  { %67 = vmatpush1.bf16.msra.mxu0 %v351_v4 }
   0x9   :  { %325 = vmatpush3.bf16.msra.mxu1 %v355_v10 }
   0xa   :  { %304 = vmatmul.mubr.msk.bf16.vlgmr.msra.gmra.mrb[0].mxu0 %vm60_vm0, %v23_v9  ;;  %326 = vmatprep.subr.bf16.mxu1 %v356_v11 }
   0xd   :  { %327 = vmatpush3.bf16.msra.mxu1 %v357_v12 }
   0xe   :  { %328 = vmatprep.subr.bf16.mxu1 %v358_v13 }
  0x11   :  { %329 = vmatpush3.bf16.msra.mxu1 %v359_v14 }
  0x12   :  { %10 = vsyncpa [#allocation3], 0  ;;  %330 = vmatprep.subr.bf16.mxu1 %v360_v15  ;;  %v362_v17 = vld [vmem:[%s508_s3 + $0x68] sm:$0xff]   ;;  %v364_v19 = vld [vmem:[%s508_s3 + $0x70] sm:$0xff]   ;;  %v30_v23 = vlaneseq  ;;  %vm284_vm1 = vcmask 58368  }
  0x13   :  { %v363_v18 = vld [vmem:[%s508_s3 + $0x28] sm:$0xff]   ;;  %v365_v20 = vld [vmem:[%s508_s3 + $0x30] sm:$0xff]   ;;  %v366_v21 = vld [vmem:[%s508_s3 + $0x78] sm:$0xff]  }
  0x14   :  { %v367_v22 = vld [vmem:[%s508_s3 + $0x38] sm:$0xff]   ;;  %v31_v24 = vshrl.u32 %v30_v23, 7  ;;  %v28_v26 = vld [vmem:[%s507_s2] sm:$0x3]  ;;  %s393_s2 = smov [#allocation2]  }
  0x15   :  { %331 = vmatpush3.bf16.msra.mxu1 %v361_v16  ;;  %v305_v41 = vld [vmem:[%s509_s4] ss:$0 sm:$0xff]  ;;  %s292_s0 = sshll.u32 %s393_s2, 4  ;;  %s293_s0 = int_to_ptr.vmem [resolvable:$true] %s292_s0 }
  0x16   :  { %332 = vmatprep.subr.bf16.mxu1 %v362_v17  ;;  %v32_v25 = vsub.s32 0, %v31_v24  ;;  %v36_v27 = vsub.s32 1, %v31_v24  ;;  %s368_s10 = scalar_lea.vmem %s293_s0, 32  ;;  %p373_p1 = scmp.lt.s32.totalorder %s293_s0, %s293_s0 }
  0x17   :  { %p369_p0 = scmp.ne.s32.totalorder %s293_s0, %s368_s10  ;;  %p374_p2 = scmp.lt.s32.totalorder %s368_s10, %s368_s10 }
  0x18   :  { %v33_v28 = vrot.slane %v28_v26, %v32_v25  ;;  %v37_v29 = vrot.slane %v28_v26, %v36_v27 }
  0x19   :  { %333 = vmatpush3.bf16.msra.mxu1 %v363_v18  ;;  %p375_p3 = por %p374_p2, %p373_p1 }
  0x1a   :  { %334 = vmatprep.subr.bf16.mxu1 %v364_v19 }
  0x1b   :  { %p376_p4 = pnand %p375_p3, %p369_p0 }
  0x1d   :  { %335 = vmatpush3.bf16.msra.mxu1 %v365_v20 }
  0x1e   :  { %336 = vmatprep.subr.bf16.mxu1 %v366_v21 }
  0x21   :  { %337 = vmatpush3.bf16.msra.mxu1 %v367_v22 }
  0xdd   :  { %v98_v30 = vpop.f32.mrb[0].mxu0 }
  0xde   :  { %v99_v31 = vadd.f32 %v98_v30, %v33_v28  ;;  %v100_v32 = vpop.f32.mrb[1].mxu0 }
  0xdf   :  { %v101_v33 = vadd.f32 %v100_v32, %v37_v29  ;;  %v102_v34 = vpop.f32.mrb[2].mxu0 }
  0xe0   :  { %v105_v35 = vmax.f32 %v99_v31, 0.0  ;;  %v103_v36 = vpop.f32.mrb[3].mxu0 }
  0xe1   :  { %v106_v37 = vmax.f32 %v101_v33, 0.0 }
  0xe2   :  { %v107_v39 = vpack.c.bf16 %v105_v35, %v105_v35 }
  0xe3   :  { %v108_v38 = vpack.c.bf16 %v106_v37, %v106_v37 }
  0xe5   :  { %276 = vmatprep.mubr.bf16.mxu1 %v108_v38 }
  0xe6   :  { %277 = vmatmul.mubr.bf16.vlgmr.msra.gmra.mrb[0].mxu1 %v107_v39 }
 0x1b9   :  { %v338_v40 = vpop.f32.mrb[0].mxu1 }
 0x1ba   :  { %v339_v42 = vpop.f32.mrb[1].mxu1 }
 0x1bb   :  { %v340_v43 = vadd.f32 %v339_v42, %v338_v40  ;;  %v341_v44 = vpop.f32.mrb[2].mxu1 }
 0x1bc   :  { %v342_v45 = vpop.f32.mrb[3].mxu1 }
 0x1bd   :  { %v279_v46 = vadd.f32 %v340_v43, %v305_v41 }
 0x1bf   :  { %285 = vst.msk [vmem:[#allocation2] sm:$0x3] %vm284_vm1, %v279_v46 }
 0x1c0   :  { %379 = shalt.err (!%p376_p4)
}
 0x1c1   :  { %s380_s4 = scalar_lea.hbm %s510_s5, 32 }
 0x1c2   :  { %p381_p5 = scmp.ne.s32.totalorder %s510_s5, %s380_s4  ;;  %p384_p6 = scmp.lt.u32.totalorder %s380_s4, %s510_s5 }
 0x1c4   :  { %p386_p7 = pnand %p384_p6, %p381_p5 }
 0x1c6   :  { %389 = shalt.err (!%p386_p7)
}
 0x1c7   :  { %295 = dma.vmem_to_hbm [thread:$0]  %s293_s0, 32, %s510_s5, [#allocation3]  }
 0x1c8   :  { %390 = dma.done.wait [#allocation3], 32  }
 0x1c9   :  { %391 = vsyncadd [#allocation3], 4294967264 }
 0x1ca   :  { %299 = vsyncpa [#allocation3], 1 }

</bundles_post_ra>
